<compile_context>
chip_gen: v7x
topology: tpu7x:2x2x1
jax: 0.10.0
libtpu: 0.0.40
codegen_flags: <defaults>
</compile_context>

<pallas_src>
import jax
import jax.numpy as jnp
from jax.experimental import pallas as pl
from jax.experimental.pallas import tpu as pltpu

_LANE = 128
_SUBLANE = 8


def _round_up(x, m):
    return ((x + m - 1) // m) * m


def _vmem_capacity_bytes():
    """Per-generation VMEM capacity (v5e/v6e: 128 MiB, v7x: 64 MiB per core)."""
    try:
        info = pltpu.get_tpu_info()
        cap = getattr(info, "vmem_capacity_bytes", None)
        if cap:
            return int(cap)
    except Exception:
        pass
    return 64 * 1024 * 1024  # v7x-safe fallback if the query is unavailable


def _default_tn(n):
    """Batch tile: multiple of 8.  Prefer 256 rows (fills the 256-wide v6e/v7x
    MXU LHS) but keep >= 2 batch tiles when possible so both v7x TensorCores
    get work; tiny batches just use round_up(N, 8)."""
    if n <= _LANE:
        return _round_up(max(n, 1), _SUBLANE)
    return 256 if _round_up(n, _LANE) // _LANE >= 4 else _LANE


# ----------------------------------------------------------------------------
# Kernels
# ----------------------------------------------------------------------------
def _packed_kernel(x_ref, w1_ref, b1_ref, w2_ref, b2_ref, out_ref):
    """All members packed along the lane axis; one batch tile per grid step.

    x_ref  : (tn, D)      compute dtype (bf16)
    w1_ref : (D, M*H)     member W1s concatenated along lanes (resident)
    b1_ref : (1, M*H)     f32
    w2_ref : (M*H, Cp)    block-diagonal member W2s, Cp = round_up(M*C, 128)
    b2_ref : (1, Cp)      f32
    out_ref: (tn, Cp)     lane-dense output slab (compute dtype)
    """
    x = x_ref[...]
    h = jnp.dot(x, w1_ref[...], preferred_element_type=jnp.float32)
    h = jnp.maximum(h + b1_ref[...], 0.0)          # f32 bias + ReLU on the VPU
    y = jnp.dot(h.astype(w2_ref.dtype), w2_ref[...],
                preferred_element_type=jnp.float32)
    out_ref[...] = (y + b2_ref[...]).astype(out_ref.dtype)


def _make_tiled_kernel(tm, kt):
    """Model-tiled / batch-tiled / K-tiled forward (tm members, kt K steps)."""

    def kernel(x_ref, w1_ref, b1_ref, w2_ref, b2_ref, out_ref, h_acc):
        # x_ref  : (tn, tk)     bf16      b1_ref : (tm, 1, H)   f32
        # w1_ref : (tm, tk, H)  bf16      w2_ref : (tm, H, Cp)  bf16
        # b2_ref : (tm, 1, Cp)  f32       out_ref: (tm, tn, Cp)
        # h_acc  : (tm, tn, H)  f32 VMEM scratch, accumulates x @ W1 over K
        ki = pl.program_id(2)

        @pl.when(ki == 0)
        def _init():
            h_acc[...] = jnp.zeros_like(h_acc)

        x = x_ref[...]
        for m in range(tm):                        # bounded unroll: tm <= 8
            h_acc[m] += jnp.dot(x, w1_ref[m],
                                preferred_element_type=jnp.float32)

        @pl.when(ki == kt - 1)
        def _finalize():
            for m in range(tm):
                h = jnp.maximum(h_acc[m] + b1_ref[m], 0.0)
                y = jnp.dot(h.astype(w2_ref.dtype), w2_ref[m],
                            preferred_element_type=jnp.float32)
                out_ref[m] = (y + b2_ref[m]).astype(out_ref.dtype)

    return kernel


# ----------------------------------------------------------------------------
# One-time parameter packing + tile planning
# ----------------------------------------------------------------------------
def _choose_tiled_plan(M, D, H, C, budget, cb, *, tm_override=None,
                       tk_override=None):
    Cp = _round_up(C, _LANE)
    if tm_override is not None:
        tm_cands = [int(tm_override)]
    else:
        base = [t for t in (8, 4, 2, 1) if t <= M]
        # prefer tm that divides M so no padded (zero-weight) members run
        tm_cands = ([t for t in base if M % t == 0] +
                    [t for t in base if M % t != 0]) or [1]
    if tk_override is not None:
        assert tk_override % _LANE == 0, "tk must be a multiple of 128"
        tk_cands = [int(tk_override)]
    else:
        tk_cands = [512, 256, 128]

    for tmc in tm_cands:
        for tkc in tk_cands:
            for tnc in (256, 128):
                need = (2 * tmc * (tkc * H + H * Cp) * cb   # W1/W2 tiles (x2 buffers)
                        + 2 * tmc * (H + Cp) * 4            # bias tiles
                        + 2 * tnc * tkc * cb                # x tile
                        + 2 * tmc * tnc * Cp * cb           # output tile
                        + tmc * tnc * H * 4)                # f32 hidden accumulator
                if need <= budget:
                    return dict(tm=tmc, tk=tkc, Dp=_round_up(D, tkc),
                                Cp=Cp, tn_max=tnc)
    # Nothing fit the budget: smallest legal plan.
    # TODO(synk): also tile H (second-layer K axis) for extremely large hidden dims.
    tm_fb = tm_cands[-1] if tm_override is not None else 1
    return dict(tm=tm_fb, tk=tk_cands[-1], Dp=_round_up(D, tk_cands[-1]),
                Cp=Cp, tn_max=128)


def pack_ensemble_params(w1, b1, w2, b2, *, compute_dtype=jnp.bfloat16,
                         mode="auto", tm=None, tk=None):
    """Pad/cast/pack the stacked member parameters ONCE (hoisted out of the
    per-call path) and pick a VMEM-budgeted tile plan for this generation."""
    if mode not in ("auto", "packed", "tiled"):
        raise ValueError("mode must be 'auto', 'packed' or 'tiled'")
    M, D, H = w1.shape
    C = w2.shape[-1]
    b1 = b1.reshape(M, 1, H)
    b2 = b2.reshape(M, 1, C)

    cap = _vmem_capacity_bytes()
    budget = int(cap * 0.7)                      # tile-plan budget (headroom left)
    vmem_limit = max(min(int(cap * 0.9), 100 * 1024 * 1024), 32 * 1024 * 1024)
    cb = jnp.dtype(compute_dtype).itemsize

    Hs, Cs = M * H, M * C
    Cs_pad = _round_up(Cs, _LANE)
    # Conservative packed-path footprint (everything double-buffered, tn<=256).
    packed_need = (2 * (D * Hs + Hs * Cs_pad) * cb
                   + 2 * (Hs + Cs_pad) * 4
                   + 2 * 256 * D * cb
                   + 2 * 256 * Cs_pad * cb)
    use_packed = (mode == "packed" or
                  (mode == "auto" and packed_need <= budget and Hs <= 4096))

    if use_packed:
        # Pack member W1 columns along the lane axis and build a block-diagonal
        # W2 so the whole ensemble step is two dense, fully lane-occupied matmuls.
        w1p = jnp.transpose(w1, (1, 0, 2)).reshape(D, Hs).astype(compute_dtype)
        b1p = b1.reshape(1, Hs).astype(jnp.float32)
        eye = jnp.eye(M, dtype=w2.dtype)
        w2bd = jnp.einsum("mhc,mn->mhnc", w2, eye).reshape(Hs, Cs)
        w2bd = jnp.pad(w2bd, ((0, 0), (0, Cs_pad - Cs))).astype(compute_dtype)
        b2p = jnp.pad(b2.reshape(1, Cs),
                      ((0, 0), (0, Cs_pad - Cs))).astype(jnp.float32)
        return dict(mode="packed", dims=(M, D, H, C),
                    compute_dtype=compute_dtype, vmem_limit=vmem_limit,
                    arrays=(w1p, b1p, w2bd, b2p),
                    plan=dict(Hs=Hs, Cs=Cs, Cs_pad=Cs_pad, tn_max=256))

    plan = _choose_tiled_plan(M, D, H, C, budget, cb,
                              tm_override=tm, tk_override=tk)
    tm_, tk_, Dp, Cp = plan["tm"], plan["tk"], plan["Dp"], plan["Cp"]
    Mp = _round_up(M, tm_)
    w1t = jnp.pad(w1, ((0, Mp - M), (0, Dp - D), (0, 0))).astype(compute_dtype)
    b1t = jnp.pad(b1, ((0, Mp - M), (0, 0), (0, 0))).astype(jnp.float32)
    w2t = jnp.pad(w2, ((0, Mp - M), (0, 0), (0, Cp - C))).astype(compute_dtype)
    b2t = jnp.pad(b2, ((0, Mp - M), (0, 0), (0, Cp - C))).astype(jnp.float32)
    return dict(mode="tiled", dims=(M, D, H, C),
                compute_dtype=compute_dtype, vmem_limit=vmem_limit,
                arrays=(w1t, b1t, w2t, b2t), plan=plan)


# ----------------------------------------------------------------------------
# Forward
# ----------------------------------------------------------------------------
def ensemble_forward(x, w1=None, b1=None, w2=None, b2=None, *, packed=None,
                     compute_dtype=jnp.bfloat16, tn=None):
    """Ensemble forward: x (N, D) -> (n_models, N, C) float32, matching
    torch.cat([model(x).unsqueeze(0) for model in models], axis=0)."""
    if packed is None:
        packed = pack_ensemble_params(w1, b1, w2, b2,
                                      compute_dtype=compute_dtype)
    M, D, H, C = packed["dims"]
    cdt = packed["compute_dtype"]
    vmem_limit = packed["vmem_limit"]
    plan = packed["plan"]
    N = x.shape[0]
    assert x.shape[1] == D, "feature dim mismatch with packed params"

    if tn is None:
        tn_ = min(plan["tn_max"], _default_tn(N))
    else:
        tn_ = max(_SUBLANE, _round_up(int(tn), _SUBLANE))
    Np = _round_up(N, tn_)

    if packed["mode"] == "packed":
        w1p, b1p, w2bd, b2p = packed["arrays"]
        Hs, Cs, Cs_pad = plan["Hs"], plan["Cs"], plan["Cs_pad"]
        x_p = jnp.pad(x, ((0, Np - N), (0, 0))).astype(cdt)
        out = pl.pallas_call(
            _packed_kernel,
            out_shape=jax.ShapeDtypeStruct((Np, Cs_pad), cdt),
            grid_spec=pltpu.PrefetchScalarGridSpec(
                num_scalar_prefetch=0,
                grid=(Np // tn_,),
                in_specs=[
                    pl.BlockSpec((tn_, D), lambda ni: (ni, 0)),
                    # constant index maps -> weights/biases DMA'd once, resident
                    pl.BlockSpec((D, Hs), lambda ni: (0, 0)),
                    pl.BlockSpec((1, Hs), lambda ni: (0, 0)),
                    pl.BlockSpec((Hs, Cs_pad), lambda ni: (0, 0)),
                    pl.BlockSpec((1, Cs_pad), lambda ni: (0, 0)),
                ],
                out_specs=pl.BlockSpec((tn_, Cs_pad), lambda ni: (ni, 0)),
            ),
            compiler_params=pltpu.CompilerParams(
                dimension_semantics=("parallel",),
                vmem_limit_bytes=vmem_limit,
            ),
        )(x_p, w1p, b1p, w2bd, b2p)
        y = out[:N, :Cs].reshape(N, M, C)
        return jnp.transpose(y, (1, 0, 2)).astype(jnp.float32)

    # ---- general tiled path: grid (model tiles, batch tiles, K tiles) ----
    w1t, b1t, w2t, b2t = packed["arrays"]
    tm_, tk_, Dp, Cp = plan["tm"], plan["tk"], plan["Dp"], plan["Cp"]
    Mp = w1t.shape[0]
    kt = Dp // tk_
    x_p = jnp.pad(x, ((0, Np - N), (0, Dp - D))).astype(cdt)
    out = pl.pallas_call(
        _make_tiled_kernel(tm_, kt),
        out_shape=jax.ShapeDtypeStruct((Mp, Np, Cp), cdt),
        grid_spec=pltpu.PrefetchScalarGridSpec(
            num_scalar_prefetch=0,
            grid=(Mp // tm_, Np // tn_, kt),
            in_specs=[
                pl.BlockSpec((tn_, tk_), lambda mi, ni, ki: (ni, ki)),
                pl.BlockSpec((tm_, tk_, H), lambda mi, ni, ki: (mi, ki, 0)),
                pl.BlockSpec((tm_, 1, H), lambda mi, ni, ki: (mi, 0, 0)),
                pl.BlockSpec((tm_, H, Cp), lambda mi, ni, ki: (mi, 0, 0)),
                pl.BlockSpec((tm_, 1, Cp), lambda mi, ni, ki: (mi, 0, 0)),
            ],
            out_specs=pl.BlockSpec((tm_, tn_, Cp),
                                   lambda mi, ni, ki: (mi, ni, 0)),
            scratch_shapes=[pltpu.VMEM((tm_, tn_, H), jnp.float32)],
        ),
        compiler_params=pltpu.CompilerParams(
            dimension_semantics=("parallel", "parallel", "arbitrary"),
            vmem_limit_bytes=vmem_limit,
        ),
    )(x_p, w1t, b1t, w2t, b2t)
    return out[:M, :N, :C].astype(jnp.float32)


# ----------------------------------------------------------------------------
# Helpers for the demo
# ----------------------------------------------------------------------------
def init_ensemble_params(key, n_models, in_dim, hidden_dim, n_classes):
    """Deterministic per-member parameter init (mimics Ensemble.reset())."""
    k1, k2, k3, k4 = jax.random.split(key, 4)
    w1 = jax.random.normal(k1, (n_models, in_dim, hidden_dim),
                           jnp.float32) / jnp.sqrt(in_dim)
    b1 = jax.random.normal(k2, (n_models, 1, hidden_dim), jnp.float32) * 0.01
    w2 = jax.random.normal(k3, (n_models, hidden_dim, n_classes),
                           jnp.float32) / jnp.sqrt(hidden_dim)
    b2 = jax.random.normal(k4, (n_models, 1, n_classes), jnp.float32) * 0.01
    return w1, b1, w2, b2


def ensemble_reference(x, w1, b1, w2, b2):
    """Pure-JAX f32 reference (same math, no Pallas)."""
    h = jnp.maximum(jnp.einsum("nd,mdh->mnh", x, w1) + b1, 0.0)
    return jnp.einsum("mnh,mhc->mnc", h, w2) + b2


if __name__ == "__main__":
    key = jax.random.PRNGKey(0)
    kx1, kp1, kx2, kp2 = jax.random.split(key, 4)

    # --- Test 1: tiny ensemble (demo shapes) -> packed-resident path. ---
    N, D, H, C, M = 8, 32, 32, 8, 4
    x = jax.random.normal(kx1, (N, D), jnp.float32)
    params = init_ensemble_params(kp1, M, D, H, C)
    packed = pack_ensemble_params(*params)              # one-time pack/pad/cast
    preds = jax.block_until_ready(ensemble_forward(x, packed=packed))
    ref = ensemble_reference(x, *params)
    assert preds.shape == (M, N, C)
    err = float(jnp.max(jnp.abs(preds - ref)))
    # bf16 MXU inputs + bf16 stores with f32 accumulation -> loosened tolerance.
    assert jnp.allclose(preds, ref, atol=3e-2, rtol=3e-2), err

    # --- Test 2: force the model/batch/K-tiled path (accumulator + pl.when). ---
    N2, D2, H2, C2, M2 = 64, 256, 64, 8, 6
    x2 = jax.random.normal(kx2, (N2, D2), jnp.float32)
    params2 = init_ensemble_params(kp2, M2, D2, H2, C2)
    packed2 = pack_ensemble_params(*params2, mode="tiled", tk=128)  # kt=2, tm=2
    preds2 = jax.block_until_ready(ensemble_forward(x2, packed=packed2))
    ref2 = ensemble_reference(x2, *params2)
    assert preds2.shape == (M2, N2, C2)
    err2 = float(jnp.max(jnp.abs(preds2 - ref2)))
    assert jnp.allclose(preds2, ref2, atol=3e-2, rtol=3e-2), err2

    print("KERNEL_OK")
</pallas_src>

<mosaic_0001>
module attributes {stable_mosaic.version = 11 : i64} {
  func.func @_packed_kernel(%arg0: i32, %arg1: memref<8x32xbf16, #tpu.memory_space<vmem>>, %arg2: memref<32x128xbf16, #tpu.memory_space<vmem>>, %arg3: memref<1x128xf32, #tpu.memory_space<vmem>>, %arg4: memref<128x128xbf16, #tpu.memory_space<vmem>>, %arg5: memref<1x128xf32, #tpu.memory_space<vmem>>, %arg6: memref<8x128xbf16, #tpu.memory_space<vmem>>) attributes {dimension_semantics = [#tpu.dimension_semantics<parallel>], iteration_bounds = array<i64: 1>, scalar_prefetch = 0 : i64, scratch_operands = 0 : i64, tpu.core_type = #tpu.core_type<tc>, window_params = [{transform_indices = @transform_0, window_bounds = array<i64: 8, 32>}, {pipeline_mode = #tpu.pipeline_mode<synchronous>, transform_indices = @transform_1, window_bounds = array<i64: 32, 128>}, {pipeline_mode = #tpu.pipeline_mode<synchronous>, transform_indices = @transform_2, window_bounds = array<i64: 1, 128>}, {pipeline_mode = #tpu.pipeline_mode<synchronous>, transform_indices = @transform_3, window_bounds = array<i64: 128, 128>}, {pipeline_mode = #tpu.pipeline_mode<synchronous>, transform_indices = @transform_4, window_bounds = array<i64: 1, 128>}, {transform_indices = @transform_5, window_bounds = array<i64: 8, 128>}]} {
    %c0 = arith.constant 0 : index
    %c0_0 = arith.constant 0 : index
    %0 = vector.load %arg1[%c0, %c0_0] : memref<8x32xbf16, #tpu.memory_space<vmem>>, vector<8x32xbf16>
    %c0_1 = arith.constant 0 : index
    %c0_2 = arith.constant 0 : index
    %1 = vector.load %arg2[%c0_1, %c0_2] : memref<32x128xbf16, #tpu.memory_space<vmem>>, vector<32x128xbf16>
    %cst = arith.constant dense<0.000000e+00> : vector<8x128xf32>
    %2 = tpu.matmul %0, %1, %cst {dimension_numbers = #tpu.dot_dimension_numbers<[1], [0], [0], [1], [0, 0, 1, 1], [], []>} : vector<8x32xbf16>, vector<32x128xbf16>, vector<8x128xf32> -> vector<8x128xf32>
    %c0_3 = arith.constant 0 : index
    %c0_4 = arith.constant 0 : index
    %3 = vector.load %arg3[%c0_3, %c0_4] : memref<1x128xf32, #tpu.memory_space<vmem>>, vector<1x128xf32>
    %4 = vector.broadcast %3 : vector<1x128xf32> to vector<8x128xf32>
    %5 = arith.addf %2, %4 : vector<8x128xf32>
    %cst_5 = arith.constant 0.000000e+00 : f32
    %6 = vector.broadcast %cst_5 : f32 to vector<8x128xf32>
    %7 = arith.maximumf %5, %6 : vector<8x128xf32>
    %8 = arith.truncf %7 : vector<8x128xf32> to vector<8x128xbf16>
    %c0_6 = arith.constant 0 : index
    %c0_7 = arith.constant 0 : index
    %9 = vector.load %arg4[%c0_6, %c0_7] : memref<128x128xbf16, #tpu.memory_space<vmem>>, vector<128x128xbf16>
    %cst_8 = arith.constant dense<0.000000e+00> : vector<8x128xf32>
    %10 = tpu.matmul %8, %9, %cst_8 {dimension_numbers = #tpu.dot_dimension_numbers<[1], [0], [0], [1], [0, 0, 1, 1], [], []>} : vector<8x128xbf16>, vector<128x128xbf16>, vector<8x128xf32> -> vector<8x128xf32>
    %c0_9 = arith.constant 0 : index
    %c0_10 = arith.constant 0 : index
    %11 = vector.load %arg5[%c0_9, %c0_10] : memref<1x128xf32, #tpu.memory_space<vmem>>, vector<1x128xf32>
    %12 = vector.broadcast %11 : vector<1x128xf32> to vector<8x128xf32>
    %13 = arith.addf %10, %12 : vector<8x128xf32>
    %14 = arith.truncf %13 : vector<8x128xf32> to vector<8x128xbf16>
    %c0_11 = arith.constant 0 : index
    %c0_12 = arith.constant 0 : index
    %15 = vector.load %arg6[%c0_11, %c0_12] : memref<8x128xbf16, #tpu.memory_space<vmem>>, vector<8x128xbf16>
    tpu.vector_store %arg6[%c0_11, %c0_12], %14 {strides = array<i32>} : memref<8x128xbf16, #tpu.memory_space<vmem>>, vector<8x128xbf16>,
    return
  }
  func.func @transform_0(%arg0: i32) -> (i32, i32) {
    %c0_i32 = arith.constant 0 : i32
    %c0_i32_0 = arith.constant 0 : i32
    return %arg0, %c0_i32 : i32, i32
  }
  func.func @transform_1(%arg0: i32) -> (i32, i32) {
    %c0_i32 = arith.constant 0 : i32
    %c0_i32_0 = arith.constant 0 : i32
    %c0_i32_1 = arith.constant 0 : i32
    return %c0_i32, %c0_i32_0 : i32, i32
  }
  func.func @transform_2(%arg0: i32) -> (i32, i32) {
    %c0_i32 = arith.constant 0 : i32
    %c0_i32_0 = arith.constant 0 : i32
    %c0_i32_1 = arith.constant 0 : i32
    return %c0_i32, %c0_i32_0 : i32, i32
  }
  func.func @transform_3(%arg0: i32) -> (i32, i32) {
    %c0_i32 = arith.constant 0 : i32
    %c0_i32_0 = arith.constant 0 : i32
    %c0_i32_1 = arith.constant 0 : i32
    return %c0_i32, %c0_i32_0 : i32, i32
  }
  func.func @transform_4(%arg0: i32) -> (i32, i32) {
    %c0_i32 = arith.constant 0 : i32
    %c0_i32_0 = arith.constant 0 : i32
    %c0_i32_1 = arith.constant 0 : i32
    return %c0_i32, %c0_i32_0 : i32, i32
  }
  func.func @transform_5(%arg0: i32) -> (i32, i32) {
    %c0_i32 = arith.constant 0 : i32
    %c0_i32_0 = arith.constant 0 : i32
    return %arg0, %c0_i32 : i32, i32
  }
}

</mosaic_0001>

<bundles_post_ra>
// kernel: tpu_custom_call.1
= control target key start
LH: loop header
LB: loop body
LE: loop exit
PB: predicated region body
PF: predicated region fallthrough
CT: control target
= control target key end

     0   :  { %10 = vsyncpa [#allocation3], 0  ;;  %s523_s0 = inlined_call_operand.hbm [shape: bf16[8,32], index: 0, kind: input, shape index: {}]   ;;  %s524_s1 = inlined_call_operand.hbm [shape: bf16[32,128], index: 1, kind: input, shape index: {}]   ;;  %s525_s2 = inlined_call_operand.vmem [shape: f32[1,128], index: 2, kind: input, shape index: {}]   ;;  %s526_s3 = inlined_call_operand.hbm [shape: bf16[128,128], index: 3, kind: input, shape index: {}]   ;;  %s527_s4 = inlined_call_operand.vmem [shape: f32[1,128], index: 4, kind: input, shape index: {}]   ;;  %s528_s5 = inlined_call_operand.hbm [shape: bf16[8,128], index: 5, kind: output, shape index: {}]  }
   0x1   :  { %11 = vsyncpa [#allocation6], 0 }
   0x2   :  { %12 = vsyncpa [#allocation4], 0  ;;  %s425_s18 = smov [#allocation5]   ;;  %s331_s22 = scalar_lea.hbm %s524_s1, 256 }
   0x3   :  { %s28_s19 = sshll.u32 %s425_s18, 4  ;;  %p332_p0 = scmp.ne.s32.totalorder %s524_s1, %s331_s22  ;;  %s29_s19 = int_to_ptr.vmem [resolvable:$true] %s28_s19 }
   0x4   :  { %p335_p1 = scmp.lt.u32.totalorder %s331_s22, %s524_s1 }
   0x6   :  { %p337_p2 = pnand %p335_p1, %p332_p0 }
   0x8   :  { %340 = shalt.err (!%p337_p2)
}
   0x9   :  { %s341_s27 = scalar_lea.vmem %s29_s19, 256  ;;  %p346_p4 = scmp.lt.s32.totalorder %s29_s19, %s29_s19 }
   0xa   :  { %p342_p3 = scmp.ne.s32.totalorder %s29_s19, %s341_s27  ;;  %p347_p5 = scmp.lt.s32.totalorder %s341_s27, %s341_s27 }
   0xc   :  { %p348_p6 = por %p347_p5, %p346_p4 }
   0xe   :  { %p349_p7 = pnand %p348_p6, %p342_p3 }
  0x10   :  { %352 = shalt.err (!%p349_p7)
}
  0x11   :  { %s426_s28 = smov 64   ;;  %s427_s29 = smov 4  }
  0x12   :  { %34 = dma.hbm_to_vmem [thread:$0]  %s524_s1, 256, %s29_s19, [#allocation6], %s426_s28, %s426_s28, %s427_s29  }
  0x13   :  { %s428_s7 = smov [#allocation2]   ;;  %s429_s9 = smov [#allocation7]  }
  0x14   :  { %s19_s8 = sshll.u32 %s428_s7, 4  ;;  %s42_s10 = sshll.u32 %s429_s9, 4  ;;  %s20_s8 = int_to_ptr.vmem [resolvable:$true] %s19_s8  ;;  %s43_s10 = int_to_ptr.vmem [resolvable:$true] %s42_s10 }
  0x15   :  { %s353_s13 = scalar_lea.hbm %s523_s0, 64 }
  0x16   :  { %p354_p8 = scmp.ne.s32.totalorder %s523_s0, %s353_s13  ;;  %p357_p9 = scmp.lt.u32.totalorder %s353_s13, %s523_s0 }
  0x18   :  { %p359_p10 = pnand %p357_p9, %p354_p8 }
  0x1a   :  { %362 = shalt.err (!%p359_p10)
}
  0x1b   :  { %s363_s1 = scalar_lea.vmem %s20_s8, 64  ;;  %p368_p12 = scmp.lt.s32.totalorder %s20_s8, %s20_s8 }
  0x1c   :  { %p364_p11 = scmp.ne.s32.totalorder %s20_s8, %s363_s1  ;;  %p369_p13 = scmp.lt.s32.totalorder %s363_s1, %s363_s1 }
  0x1e   :  { %p370_p0 = por %p369_p13, %p368_p12 }
  0x20   :  { %p371_p1 = pnand %p370_p0, %p364_p11 }
  0x22   :  { %374 = shalt.err (!%p371_p1)
}
  0x23   :  { %22 = dma.hbm_to_vmem [thread:$0]  %s523_s0, 64, %s20_s8, [#allocation3]  }
  0x24   :  { %s375_s22 = scalar_lea.hbm %s526_s3, 1024 }
  0x25   :  { %p376_p2 = scmp.ne.s32.totalorder %s526_s3, %s375_s22  ;;  %p379_p3 = scmp.lt.u32.totalorder %s375_s22, %s526_s3 }
  0x27   :  { %p381_p4 = pnand %p379_p3, %p376_p2 }
  0x29   :  { %384 = shalt.err (!%p381_p4)
}
  0x2a   :  { %s385_s27 = scalar_lea.vmem %s43_s10, 1024  ;;  %p390_p6 = scmp.lt.s32.totalorder %s43_s10, %s43_s10 }
  0x2b   :  { %p386_p5 = scmp.ne.s32.totalorder %s43_s10, %s385_s27  ;;  %p391_p7 = scmp.lt.s32.totalorder %s385_s27, %s385_s27 }
  0x2d   :  { %p392_p8 = por %p391_p7, %p390_p6 }
  0x2f   :  { %p393_p9 = pnand %p392_p8, %p386_p5 }
  0x31   :  { %396 = shalt.err (!%p393_p9)
}
  0x32   :  { %48 = dma.hbm_to_vmem [thread:$0]  %s526_s3, 1024, %s43_s10, [#allocation6], %s426_s28, %s426_s28, %s427_s29  }
  0x33   :  { %419 = dma.done.wait [#allocation3], 64  }
  0x34   :  { %420 = vsyncadd [#allocation3], 4294967232 }
  0x35   :  { %421 = dma.done.wait [#allocation6], 1280  }
  0x36   :  { %422 = vsyncadd [#allocation6], 4294966016  ;;  %v430_v0 = vmov 0.0   ;;  %vm431_vm0 = vmmov 0   ;;  %v321_v1 = vld [vmem:[#allocation5] sm:$0xff]   ;;  %v322_v2 = vld [vmem:[#allocation5 + $0x8] sm:$0xff]  }
  0x37   :  { %285 = vmatprep.subr.bf16.mxu0 %v430_v0  ;;  %289 = vmatprep.mubr.msk.bf16.mxu0 %vm431_vm0, %v430_v0  ;;  %v323_v3 = vld [vmem:[#allocation7] sm:$0xff]   ;;  %vm85_vm1 = vcmask 261120   ;;  %v324_v4 = vld [vmem:[#allocation7 + $0x8] sm:$0xff]   ;;  %v325_v6 = vld [vmem:[#allocation7 + $0x10] sm:$0xff]   ;;  %s432_s7 = smov [#allocation8]  }
  0x38   :  { %293 = vmatprep.subr.bf16.mxu1 %v430_v0  ;;  %309 = vmatprep.mubr.msk.bf16.mxu1 %vm431_vm0, %v430_v0  ;;  %v61_v5 = vld [vmem:[#allocation2] sm:$0xf]  ;;  %v326_v7 = vld [vmem:[#allocation7 + $0x18] sm:$0xff]   ;;  %v327_v8 = vld [vmem:[#allocation7 + $0x20] sm:$0xff]   ;;  %s250_s8 = sshll.u32 %s432_s7, 4  ;;  %s251_s8 = int_to_ptr.vmem [resolvable:$true] %s250_s8 }
  0x39   :  { %286 = vmatpush3.bf16.msra.mxu0 %v321_v1  ;;  %294 = vmatpush3.bf16.msra.mxu1 %v323_v3  ;;  %v328_v9 = vld [vmem:[#allocation7 + $0x28] sm:$0xff]   ;;  %v329_v10 = vld [vmem:[#allocation7 + $0x30] sm:$0xff]   ;;  %v330_v11 = vld [vmem:[#allocation7 + $0x38] sm:$0xff]   ;;  %p402_p11 = scmp.lt.s32.totalorder %s251_s8, %s251_s8 }
  0x3a   :  { %287 = vmatprep.subr.bf16.mxu0 %v430_v0  ;;  %295 = vmatprep.subr.bf16.mxu1 %v430_v0  ;;  %v260_v12 = vld [vmem:[%s525_s2] ss:$0 sm:$0xff]  ;;  %s397_s2 = scalar_lea.vmem %s251_s8, 64 }
  0x3b   :  { %v264_v20 = vld [vmem:[%s527_s4] ss:$0 sm:$0xff]  ;;  %p398_p10 = scmp.ne.s32.totalorder %s251_s8, %s397_s2  ;;  %p403_p12 = scmp.lt.s32.totalorder %s397_s2, %s397_s2 }
  0x3d   :  { %288 = vmatpush3.bf16.msra.mxu0 %v322_v2  ;;  %296 = vmatpush3.bf16.msra.mxu1 %v324_v4  ;;  %p404_p13 = por %p403_p12, %p402_p11 }
  0x3e   :  { %297 = vmatprep.subr.bf16.mxu1 %v430_v0 }
  0x3f   :  { %p405_p0 = pnand %p404_p13, %p398_p10 }
  0x40   :  { %290 = vmatmul.mubr.msk.bf16.vlgmr.msra.gmra.mrb[0].mxu0 %vm85_vm1, %v61_v5 }
  0x41   :  { %298 = vmatpush3.bf16.msra.mxu1 %v325_v6 }
  0x42   :  { %299 = vmatprep.subr.bf16.mxu1 %v430_v0 }
  0x45   :  { %300 = vmatpush3.bf16.msra.mxu1 %v326_v7 }
  0x46   :  { %301 = vmatprep.subr.bf16.mxu1 %v430_v0 }
  0x49   :  { %302 = vmatpush3.bf16.msra.mxu1 %v327_v8 }
  0x4a   :  { %303 = vmatprep.subr.bf16.mxu1 %v430_v0 }
  0x4d   :  { %304 = vmatpush3.bf16.msra.mxu1 %v328_v9 }
  0x4e   :  { %305 = vmatprep.subr.bf16.mxu1 %v430_v0 }
  0x51   :  { %306 = vmatpush3.bf16.msra.mxu1 %v329_v10 }
  0x52   :  { %307 = vmatprep.subr.bf16.mxu1 %v430_v0 }
  0x55   :  { %308 = vmatpush3.bf16.msra.mxu1 %v330_v11 }
 0x113   :  { %v123_v13 = vpop.f32.mrb[0].mxu0 }
 0x114   :  { %v124_v14 = vadd.f32 %v260_v12, %v123_v13  ;;  %v291_v15 = vpop.f32.mrb[1].mxu0 }
 0x115   :  { %v126_v16 = vpop.f32.mrb[2].mxu0 }
 0x116   :  { %v129_v17 = vmax.f32 %v124_v14, 0.0  ;;  %v292_v18 = vpop.f32.mrb[3].mxu0 }
 0x118   :  { %v130_v19 = vpack.c.bf16 %v129_v17, %v129_v17 }
 0x11a   :  { %310 = vmatmul.mubr.bf16.vlgmr.msra.gmra.mrb[0].mxu1 %v130_v19 }
 0x1ed   :  { %v236_v21 = vpop.f32.mrb[0].mxu1 }
 0x1ee   :  { %v237_v22 = vadd.f32 %v264_v20, %v236_v21  ;;  %v311_v23 = vpop.f32.mrb[1].mxu1 }
 0x1ef   :  { %v239_v24 = vpop.f32.mrb[2].mxu1 }
 0x1f0   :  { %v242_v25 = vpack.c.bf16 %v237_v22, %v237_v22  ;;  %v312_v26 = vpop.f32.mrb[3].mxu1 }
 0x1f2   :  { %243 = vst [vmem:[#allocation8] sm:$0xf] %v242_v25 }
 0x1f3   :  { %408 = shalt.err (!%p405_p0)
}
 0x1f4   :  { %s409_s4 = scalar_lea.hbm %s528_s5, 64 }
 0x1f5   :  { %p410_p1 = scmp.ne.s32.totalorder %s528_s5, %s409_s4  ;;  %p413_p2 = scmp.lt.u32.totalorder %s409_s4, %s528_s5 }
 0x1f7   :  { %p415_p3 = pnand %p413_p2, %p410_p1 }
 0x1f9   :  { %418 = shalt.err (!%p415_p3)
}
 0x1fa   :  { %253 = dma.vmem_to_hbm [thread:$0]  %s251_s8, 64, %s528_s5, [#allocation4]  }
 0x1fb   :  { %423 = dma.done.wait [#allocation4], 64  }
 0x1fc   :  { %424 = vsyncadd [#allocation4], 4294967232 }
 0x1fd   :  { %257 = vsyncpa [#allocation3], 1 }
 0x1fe   :  { %258 = vsyncpa [#allocation6], 1 }
 0x1ff   :  { %259 = vsyncpa [#allocation4], 1 }

</bundles_post_ra>
